<compile_context>
chip_gen: v6e
topology: v6e:2x2x1
jax: 0.10.0
libtpu: 0.0.40
codegen_flags: <defaults>
</compile_context>

<pallas_src>
import functools

import jax
import jax.numpy as jnp
from jax import lax
from jax.experimental import pallas as pl
from jax.experimental.pallas import tpu as pltpu


_LANES = 128
_OUT_TILE = (8, 128)          # aligned per-grid-step partial-sum tile


def _round_up(x, m):
    return -(-x // m) * m


def _focal_weight(one_minus_pt, gamma):
    """(1 - pt) ** gamma with cheap special cases (no generic pow = exp+log)."""
    if gamma == 0.5:
        return jnp.sqrt(one_minus_pt)
    if gamma == 1.0:
        return one_minus_pt
    if gamma == 2.0:
        return one_minus_pt * one_minus_pt
    return one_minus_pt ** gamma


def _per_sample_loss(x, tgt, *, gamma, class_axis):
    """Unscaled NFL per sample: term_target / sum_c(term_c) (keepdims shape).

    x   : f32 logits tile with the class axis at `class_axis`.
    tgt : int32 targets, broadcastable against x along `class_axis`.
    """
    m = jnp.max(x, axis=class_axis, keepdims=True)
    z = x - m
    ez = jnp.exp(z)                                      # EUP
    s = jnp.sum(ez, axis=class_axis, keepdims=True)
    logpt = z - jnp.log(s)                               # log_softmax
    # Approx reciprocal lowers to the EUP slot (has slack); the focal weight is
    # insensitive to its ~2^-13 relative error (review item 5).
    pt = ez * pl.reciprocal(s, approx=True)              # softmax == exp(logpt)
    w = _focal_weight(jnp.maximum(1.0 - pt, 0.0), gamma)
    term = -w * logpt                                    # -(1-pt)^g * logpt
    normalizor = jnp.sum(term, axis=class_axis, keepdims=True)
    cls = lax.broadcasted_iota(jnp.int32, term.shape, class_axis)
    numer = jnp.sum(jnp.where(cls == tgt, term, 0.0),
                    axis=class_axis, keepdims=True)
    return numer / normalizor                            # final divide kept exact


def _partial_tile(psum_11):
    """Place a (1,1) partial sum at [0,0] of an aligned (8,128) output tile."""
    r = lax.broadcasted_iota(jnp.int32, _OUT_TILE, 0)
    c = lax.broadcasted_iota(jnp.int32, _OUT_TILE, 1)
    return jnp.where((r == 0) & (c == 0), psum_11, 0.0)


def _nfl_kernel_nc(x_ref, t_ref, o_ref, *, gamma, n_valid, block_n):
    # Default path: tiles taken straight from the row-major (N, C) logits.
    # x_ref: (block_n, C)   t_ref: (block_n, 1) int32   o_ref: (8, 128) f32
    x = x_ref[...].astype(jnp.float32)
    loss = _per_sample_loss(x, t_ref[...], gamma=gamma, class_axis=1)   # (bn, 1)
    row = lax.broadcasted_iota(jnp.int32, loss.shape, 0)
    valid = (pl.program_id(0) * block_n + row) < n_valid                # tail mask
    psum = jnp.sum(jnp.where(valid, loss, 0.0), axis=0, keepdims=True)  # (1, 1)
    o_ref[...] = _partial_tile(psum)


def _nfl_kernel_cn(x_ref, t_ref, o_ref, *, gamma, n_valid, block_n):
    # Lane-dense path: producer-supplied (C, N) logits, samples on the lanes.
    # x_ref: (C, block_n)   t_ref: (1, block_n) int32   o_ref: (8, 128) f32
    x = x_ref[...].astype(jnp.float32)
    loss = _per_sample_loss(x, t_ref[...], gamma=gamma, class_axis=0)   # (1, bn)
    col = lax.broadcasted_iota(jnp.int32, loss.shape, 1)
    valid = (pl.program_id(0) * block_n + col) < n_valid                # tail mask
    psum = jnp.sum(jnp.where(valid, loss, 0.0), axis=1, keepdims=True)  # (1, 1)
    o_ref[...] = _partial_tile(psum)


def normalized_focal_loss(logits, targets, *, gamma=0.5, scale=1.0,
                          block_n=None, class_major=False):
    """Forward pass of NormalizedFocalLoss; returns the scalar mean loss.

    logits : (N, C) row-major (default, matches the PyTorch module), or
             (C, N) with class_major=True — the preferred producer layout for
             large N (fully lane-dense compute, zero transposes anywhere).
    targets: (N,) integer class ids.

    Large-N contract: pass logits in their native dtype (bf16 preferred — it
    halves the dominant HBM read); the f32 cast happens in VMEM post-DMA.
    """
    if class_major:
        c, n = logits.shape
    else:
        n, c = logits.shape

    # --- tile size --------------------------------------------------------
    if block_n is None:
        # class-major temporaries pad C to 16 sublanes (cheap) so go big;
        # batch-major temporaries pad C to 128 lanes, so stay modest.
        block_n = 32768 if class_major else 4096
    if n <= _LANES:
        block_n = n                              # one block == full batch dim
    else:
        # Multiple of 128 samples, capped at ~N/2 so the "parallel" grid keeps
        # >= 2 steps (v7x shards parallel grid axes across its 2 TensorCores).
        half = _round_up(-(-n // 2), _LANES)
        block_n = max(_LANES, (min(block_n, half) // _LANES) * _LANES)
    grid = pl.cdiv(n, block_n)

    # --- VMEM budget (review item 4) ---------------------------------------
    if class_major:
        temp_bytes = _round_up(c, 8) * block_n * 4           # (C->16, bn) f32 temps
    else:
        temp_bytes = block_n * _round_up(c, _LANES) * 4      # (bn, C->128) f32 temps
    in_bytes = 2 * block_n * c * logits.dtype.itemsize       # double-buffered logits
    vmem_limit = int(min(96 * 2 ** 20,
                         max(32 * 2 ** 20, 8 * temp_bytes + 2 * in_bytes)))
    # NOTE: v7x has only 64 MiB physical VMEM — keep block_n <= 32768 there.

    if class_major:
        kernel = functools.partial(_nfl_kernel_cn, gamma=float(gamma),
                                   n_valid=n, block_n=block_n)
        x_spec = pl.BlockSpec((c, block_n), lambda i: (0, i))
        tgt2d = targets.reshape(1, n).astype(jnp.int32)
        t_spec = pl.BlockSpec((1, block_n), lambda i: (0, i))
    else:
        kernel = functools.partial(_nfl_kernel_nc, gamma=float(gamma),
                                   n_valid=n, block_n=block_n)
        x_spec = pl.BlockSpec((block_n, c), lambda i: (i, 0))
        tgt2d = targets.reshape(n, 1).astype(jnp.int32)
        t_spec = pl.BlockSpec((block_n, 1), lambda i: (i, 0))

    partials = pl.pallas_call(
        kernel,
        out_shape=jax.ShapeDtypeStruct((_OUT_TILE[0], _OUT_TILE[1] * grid),
                                       jnp.float32),
        grid_spec=pltpu.PrefetchScalarGridSpec(
            num_scalar_prefetch=0,
            grid=(grid,),
            in_specs=[x_spec, t_spec],
            out_specs=pl.BlockSpec(_OUT_TILE, lambda i: (0, i)),
        ),
        compiler_params=pltpu.CompilerParams(
            dimension_semantics=("parallel",),
            vmem_limit_bytes=vmem_limit),
    )(logits, tgt2d)

    # `scale` and the mean stay in the wrapper; divide by the true N (padded
    # tail samples were masked to zero in-kernel).
    return (jnp.float32(scale) / jnp.float32(n)) * jnp.sum(partials)


def _reference(logits, targets, *, gamma=0.5, scale=1.0):
    """Pure-JAX reference mirroring the PyTorch forward exactly."""
    logpt = jax.nn.log_softmax(logits.astype(jnp.float32), axis=1)
    normalizor = jnp.sum(-(1.0 - jnp.exp(logpt)) ** gamma * logpt, axis=1)
    logpt_t = jnp.take_along_axis(logpt, targets.reshape(-1, 1), axis=1)[:, 0]
    pt = jnp.exp(logpt_t)
    loss = -(1.0 - pt) ** gamma * logpt_t
    loss = scale * loss / normalizor
    return jnp.mean(loss)


if __name__ == "__main__":
    key = jax.random.PRNGKey(0)
    k1, k2 = jax.random.split(key)

    # num_classes=10 per the module; N=200 (not a multiple of 128) exercises the
    # cdiv grid + masked tail and gives a 2-step "parallel" grid.
    N, NUM_CLASSES = 200, 10
    GAMMA, SCALE = 0.5, 1.0

    logits = jax.random.normal(k1, (N, NUM_CLASSES), dtype=jnp.float32)
    targets = jax.random.randint(k2, (N,), 0, NUM_CLASSES, dtype=jnp.int32)

    want = _reference(logits, targets, gamma=GAMMA, scale=SCALE)

    # Default path: row-major (N, C) logits, no HBM transpose anywhere.
    got_nc = normalized_focal_loss(logits, targets, gamma=GAMMA, scale=SCALE)
    got_nc = jax.block_until_ready(got_nc)
    # Tolerance slightly looser than pure-f32 because pt uses the EUP approx
    # reciprocal (~2^-13 rel err); the final divide is exact.
    assert jnp.allclose(got_nc, want, rtol=2e-4, atol=1e-5), (got_nc, want)

    # Producer-side class-major layout (preferred for very large N).  The
    # transpose below only builds the demo input; in real use the producer
    # emits logits already as (C, N).
    got_cn = normalized_focal_loss(jnp.swapaxes(logits, 0, 1), targets,
                                   gamma=GAMMA, scale=SCALE, class_major=True)
    got_cn = jax.block_until_ready(got_cn)
    assert jnp.allclose(got_cn, want, rtol=2e-4, atol=1e-5), (got_cn, want)

    print("KERNEL_OK")
</pallas_src>

<mosaic_0001>
module attributes {stable_mosaic.version = 11 : i64} {
  func.func @_nfl_kernel_nc(%arg0: i32, %arg1: memref<128x10xf32, #tpu.memory_space<vmem>>, %arg2: memref<128x1xi32, #tpu.memory_space<vmem>>, %arg3: memref<8x128xf32, #tpu.memory_space<vmem>>) attributes {dimension_semantics = [#tpu.dimension_semantics<parallel>], iteration_bounds = array<i64: 2>, scalar_prefetch = 0 : i64, scratch_operands = 0 : i64, tpu.core_type = #tpu.core_type<tc>, window_params = [{transform_indices = @transform_0, window_bounds = array<i64: 128, 10>}, {transform_indices = @transform_1, window_bounds = array<i64: 128, 1>}, {transform_indices = @transform_2, window_bounds = array<i64: 8, 128>}]} {
    %c0 = arith.constant 0 : index
    %c0_0 = arith.constant 0 : index
    %0 = vector.load %arg1[%c0, %c0_0] : memref<128x10xf32, #tpu.memory_space<vmem>>, vector<128x10xf32>
    %c0_1 = arith.constant 0 : index
    %c0_2 = arith.constant 0 : index
    %1 = vector.load %arg2[%c0_1, %c0_2] : memref<128x1xi32, #tpu.memory_space<vmem>>, vector<128x1xi32>
    %cst = arith.constant dense<0xFF800000> : vector<128xf32>
    %2 = vector.multi_reduction <maximumf>, %0, %cst [1] : vector<128x10xf32> to vector<128xf32>
    %3 = vector.shape_cast %2 : vector<128xf32> to vector<128x1xf32>
    %4 = vector.broadcast %3 : vector<128x1xf32> to vector<128x10xf32>
    %5 = arith.subf %0, %4 : vector<128x10xf32>
    %6 = math.exp %5 : vector<128x10xf32>
    %cst_3 = arith.constant dense<0.000000e+00> : vector<128xf32>
    %7 = vector.multi_reduction <add>, %6, %cst_3 [1] : vector<128x10xf32> to vector<128xf32>
    %8 = vector.shape_cast %7 : vector<128xf32> to vector<128x1xf32>
    %9 = math.log %8 : vector<128x1xf32>
    %10 = vector.broadcast %9 : vector<128x1xf32> to vector<128x10xf32>
    %11 = arith.subf %5, %10 : vector<128x10xf32>
    %12 = tpu.reciprocal %8 {approx = true} : vector<128x1xf32> -> vector<128x1xf32>
    %13 = vector.broadcast %12 : vector<128x1xf32> to vector<128x10xf32>
    %14 = arith.mulf %6, %13 : vector<128x10xf32>
    %cst_4 = arith.constant 1.000000e+00 : f32
    %15 = vector.broadcast %cst_4 : f32 to vector<128x10xf32>
    %16 = arith.subf %15, %14 : vector<128x10xf32>
    %cst_5 = arith.constant 0.000000e+00 : f32
    %17 = vector.broadcast %cst_5 : f32 to vector<128x10xf32>
    %18 = arith.maximumf %16, %17 : vector<128x10xf32>
    %19 = math.sqrt %18 : vector<128x10xf32>
    %cst_6 = arith.constant 0.000000e+00 : f32
    %20 = vector.broadcast %cst_6 : f32 to vector<128x10xf32>
    %21 = arith.subf %20, %19 : vector<128x10xf32>
    %22 = arith.mulf %21, %11 : vector<128x10xf32>
    %cst_7 = arith.constant dense<0.000000e+00> : vector<128xf32>
    %23 = vector.multi_reduction <add>, %22, %cst_7 [1] : vector<128x10xf32> to vector<128xf32>
    %24 = vector.shape_cast %23 : vector<128xf32> to vector<128x1xf32>
    %25 = tpu.iota {dimensions = array<i32: 1>} : vector<128x10xi32>
    %26 = vector.broadcast %1 : vector<128x1xi32> to vector<128x10xi32>
    %27 = arith.cmpi eq, %25, %26 : vector<128x10xi32>
    %cst_8 = arith.constant 0.000000e+00 : f32
    %28 = vector.broadcast %cst_8 : f32 to vector<128x10xf32>
    %29 = arith.select %27, %22, %28 : vector<128x10xi1>, vector<128x10xf32>
    %cst_9 = arith.constant dense<0.000000e+00> : vector<128xf32>
    %30 = vector.multi_reduction <add>, %29, %cst_9 [1] : vector<128x10xf32> to vector<128xf32>
    %31 = vector.shape_cast %30 : vector<128xf32> to vector<128x1xf32>
    %32 = arith.divf %31, %24 : vector<128x1xf32>
    %33 = tpu.iota {dimensions = array<i32: 0>} : vector<128x1xi32>
    %c128_i32 = arith.constant 128 : i32
    %34 = arith.muli %arg0, %c128_i32 : i32
    %35 = vector.broadcast %34 : i32 to vector<128x1xi32>
    %36 = arith.addi %35, %33 : vector<128x1xi32>
    %c200_i32 = arith.constant 200 : i32
    %37 = vector.broadcast %c200_i32 : i32 to vector<128x1xi32>
    %38 = arith.cmpi slt, %36, %37 : vector<128x1xi32>
    %cst_10 = arith.constant 0.000000e+00 : f32
    %39 = vector.broadcast %cst_10 : f32 to vector<128x1xf32>
    %40 = arith.select %38, %32, %39 : vector<128x1xi1>, vector<128x1xf32>
    %cst_11 = arith.constant dense<0.000000e+00> : vector<1xf32>
    %41 = vector.multi_reduction <add>, %40, %cst_11 [0] : vector<128x1xf32> to vector<1xf32>
    %42 = vector.shape_cast %41 : vector<1xf32> to vector<1x1xf32>
    %43 = tpu.iota {dimensions = array<i32: 0>} : vector<8x128xi32>
    %44 = tpu.iota {dimensions = array<i32: 1>} : vector<8x128xi32>
    %c0_i32 = arith.constant 0 : i32
    %45 = vector.broadcast %c0_i32 : i32 to vector<8x128xi32>
    %46 = arith.cmpi eq, %43, %45 : vector<8x128xi32>
    %c0_i32_12 = arith.constant 0 : i32
    %47 = vector.broadcast %c0_i32_12 : i32 to vector<8x128xi32>
    %48 = arith.cmpi eq, %44, %47 : vector<8x128xi32>
    %49 = arith.andi %46, %48 : vector<8x128xi1>
    %cst_13 = arith.constant 0.000000e+00 : f32
    %50 = vector.shape_cast %42 : vector<1x1xf32> to vector<1x1xf32>
    %51 = vector.broadcast %50 : vector<1x1xf32> to vector<8x128xf32>
    %52 = vector.broadcast %cst_13 : f32 to vector<8x128xf32>
    %53 = arith.select %49, %51, %52 : vector<8x128xi1>, vector<8x128xf32>
    %c0_14 = arith.constant 0 : index
    %c0_15 = arith.constant 0 : index
    %54 = vector.load %arg3[%c0_14, %c0_15] : memref<8x128xf32, #tpu.memory_space<vmem>>, vector<8x128xf32>
    tpu.vector_store %arg3[%c0_14, %c0_15], %53 {strides = array<i32>} : memref<8x128xf32, #tpu.memory_space<vmem>>, vector<8x128xf32>,
    return
  }
  func.func @transform_0(%arg0: i32) -> (i32, i32) {
    %c0_i32 = arith.constant 0 : i32
    %c0_i32_0 = arith.constant 0 : i32
    return %arg0, %c0_i32 : i32, i32
  }
  func.func @transform_1(%arg0: i32) -> (i32, i32) {
    %c0_i32 = arith.constant 0 : i32
    %c0_i32_0 = arith.constant 0 : i32
    return %arg0, %c0_i32 : i32, i32
  }
  func.func @transform_2(%arg0: i32) -> (i32, i32) {
    %c0_i32 = arith.constant 0 : i32
    %c0_i32_0 = arith.constant 0 : i32
    return %c0_i32, %arg0 : i32, i32
  }
}

</mosaic_0001>

<bundles_post_ra>
// kernel: tpu_custom_call.1
= control target key start
LH: loop header
LB: loop body
LE: loop exit
PB: predicated region body
PF: predicated region fallthrough
CT: control target
= control target key end

     0   :  { %7 = vsyncpa [#allocation3], 0  ;;  %s2080_s0 = inlined_call_operand.vmem [shape: f32[200,10], index: 0, kind: input, shape index: {}]   ;;  %s2081_s1 = inlined_call_operand.vmem [shape: s32[200,1], index: 1, kind: input, shape index: {}]   ;;  %s2082_s2 = inlined_call_operand.hbm [shape: f32[8,256], index: 2, kind: output, shape index: {}]  }
   0x1   :  { %9 = vsyncpa [#allocation3 + $0x1], 0  ;;  %s1322_s9 = smov 0   ;;  %s1324_s10 = smov 0  }
   0x2   :  { %s1326_s11 = smov 0   ;;  %s1328_s12 = smov 0  }
   0x3 LB: > { %s1343_s13 = sadd.s32 4294967295, %s1303_s12   ;;  %s1027_s14 = sadd.s32 4294967294, %s1303_s12   ;;  %s1303_s12 = sphi %s1328_s12, %s2111_s12   ;;  %s1299_s11 = sphi %s1326_s11, %s2110_s11   ;;  %s1295_s10 = sphi %s1324_s10, %s2109_s10   ;;  %s1291_s9 = sphi %s1322_s9, %s2108_s9  }
   0x4   : > { %s1347_s15 = sadd.s32 1, %s1303_s12   ;;  %s74_s16 = sadd.s32 1, %s1299_s11 }
   0x5   : > { %s71_s17 = ssub.s32 %s1303_s12, %s1347_s15  ;;  %p84_p0 = scmp.ne.s32.totalorder %s1299_s11, %s1295_s10 }
   0x6   : > { %p72_p1 = scmp.eq.s32.totalorder %s71_s17, 0  ;;  %p85_p2 = scmp.eq.s32.totalorder %s1343_s13, 1 }
   0x7   : > { %p90_p3 = scmp.ne.s32.totalorder %s1295_s10, %s1291_s9  ;;  %p91_p4 = scmp.eq.s32.totalorder %s1027_s14, 1 }
   0x8   : > { %s1358_s18 = scalar_select %p72_p1, %s1299_s11, %s74_s16  }
   0x9   : > { %p1360_p5 = por %p85_p2, %p84_p0  ;;  %p1364_p6 = por %p91_p4, %p90_p3 }
   0xa   : > { %p1030_p7 = scmp.ge.s32.totalorder %s1303_s12, 1  ;;  %p143_p8 = scmp.lt.s32.totalorder %s1303_s12, 3 }
   0xc   : > { %p144_p9 = pnand %p1030_p7, %p143_p8 }
   0xe   : > { %147 = sbr.rel (%p144_p9) target bundleno = 615 (0x267), region = 28 }
  0x13   : > { %s1032_s21 = sshll.u32 %s1343_s13, 4  ;;  %v1305_v0 = vmov 0   ;;  %vm238_vm0 = vcmask 80896   ;;  %s1036_s29 = sshll.u32 %s1343_s13, 7 }
  0x14   : > { %p183_p10 = scmp.lt.s32.totalorder %s1032_s21, 24  ;;  %1082 = vset.pattern.permute.xlu1 %v1305_v0  ;;  %1081 = vset.pattern.permute.xlu0 %v1305_v0  ;;  %s175_s30 = sand.u32 1, %s1295_s10  }
  0x15   : > { %s1031_s3 = sshll.u32 %s175_s30, 3  ;;  %s2045_s8 = scalar_lea.hbm %s2082_s2, %s1036_s29 }
  0x16   : > { %s2113_s21 = smov (!%p183_p10, %s1032_s21), 24  ;;  %s177_s4 = scalar_lea.vmem [#allocation2], %s1031_s3 }
  0x17   : > { %s1033_s22 = sshll.u32 %s2113_s21, 3  ;;  %s956_s5 = sshll.u32 %s177_s4, 4  ;;  %s957_s5 = int_to_ptr.vmem [resolvable:$true] %s956_s5 }
  0x18   : > { %s1379_s25 = scalar_lea.vmem %s2080_s0, %s1033_s22  ;;  %s1466_s28 = scalar_lea.vmem %s2081_s1, %s1033_s22 }
  0x19   : > { %v1382_v1 = vld [vmem:[%s1379_s25] sm:$0xff]  ;;  %v1385_v2 = vld [vmem:[%s1379_s25 + $0x10] sm:$0xff]  ;;  %v1388_v3 = vld [vmem:[%s1379_s25 + $0x8] sm:$0xff]  ;;  %s943_s14 = scalar_lea.sflag [#allocation3], %s175_s30  ;;  %s1243_s16 = scalar_lea.vmem %s957_s5, 128 }
  0x1a   : > { %v239_v4 = vsel %vm238_vm0, %v1382_v1, -inf  ;;  %v245_v5 = vsel %vm238_vm0, %v1385_v2, -inf  ;;  %v1395_v6 = vld [vmem:[%s1379_s25 + $0x18] sm:$0xff]  ;;  %v242_v7 = vsel %vm238_vm0, %v1388_v3, -inf  ;;  %v1402_v9 = vld [vmem:[%s1379_s25 + $0x20] sm:$0xff]  ;;  %v1405_v10 = vld [vmem:[%s1379_s25 + $0x28] sm:$0xff]  ;;  %p1244_p11 = scmp.ne.s32.totalorder %s957_s5, %s1243_s16 }
  0x1b   : > { %240 = vmax.xlane.f32.xlu0 %v239_v4  ;;  %246 = vmax.xlane.f32.xlu1 %v245_v5  ;;  %v248_v8 = vsel %vm238_vm0, %v1395_v6, -inf  ;;  %v251_v11 = vsel %vm238_vm0, %v1402_v9, -inf  ;;  %v254_v12 = vsel %vm238_vm0, %v1405_v10, -inf  ;;  %v1412_v13 = vld [vmem:[%s1379_s25 + $0x30] sm:$0xff]  ;;  %v1415_v14 = vld [vmem:[%s1379_s25 + $0x38] sm:$0xff]  ;;  %v1422_v17 = vld [vmem:[%s1379_s25 + $0x40] sm:$0xff] }
  0x1c   : > { %v257_v15 = vsel %vm238_vm0, %v1412_v13, -inf  ;;  %v260_v16 = vsel %vm238_vm0, %v1415_v14, -inf  ;;  %v1425_v18 = vld [vmem:[%s1379_s25 + $0x48] sm:$0xff]  ;;  %v263_v19 = vsel %vm238_vm0, %v1422_v17, -inf  ;;  %v1432_v21 = vld [vmem:[%s1379_s25 + $0x50] sm:$0xff]  ;;  %v1435_v22 = vld [vmem:[%s1379_s25 + $0x58] sm:$0xff]  ;;  %p1245_p12 = pnand %p1244_p11, %p1360_p5 }
  0x1d   : > { %v266_v20 = vsel %vm238_vm0, %v1425_v18, -inf  ;;  %v269_v23 = vsel %vm238_vm0, %v1432_v21, -inf  ;;  %v272_v24 = vsel %vm238_vm0, %v1435_v22, -inf  ;;  %v1442_v25 = vld [vmem:[%s1379_s25 + $0x60] sm:$0xff]  ;;  %v1445_v26 = vld [vmem:[%s1379_s25 + $0x68] sm:$0xff]  ;;  %v1452_v29 = vld [vmem:[%s1379_s25 + $0x70] sm:$0xff] }
  0x1e   : > { %v275_v27 = vsel %vm238_vm0, %v1442_v25, -inf  ;;  %v278_v28 = vsel %vm238_vm0, %v1445_v26, -inf  ;;  %v1455_v30 = vld [vmem:[%s1379_s25 + $0x78] sm:$0xff]  ;;  %v281_v31 = vsel %vm238_vm0, %v1452_v29, -inf  ;;  %v223_v33 = vld [vmem:[%s1466_s28 + $0x8] sm:$0xff]  ;;  %v224_v34 = vld [vmem:[%s1466_s28 + $0x10] sm:$0xff]  ;;  %p1246_p13 = pneg %p1245_p12 }
  0x1f   : > { %243 = vmax.xlane.f32.xlu0 %v242_v7  ;;  %249 = vmax.xlane.f32.xlu1 %v248_v8  ;;  %v284_v32 = vsel %vm238_vm0, %v1455_v30, -inf  ;;  %v222_v35 = vld [vmem:[%s1466_s28] sm:$0xff]  ;;  %v225_v36 = vld [vmem:[%s1466_s28 + $0x18] sm:$0xff]  ;;  %v227_v38 = vld [vmem:[%s1466_s28 + $0x28] sm:$0xff]  ;;  %s1306_s17 = smov [#allocation2]  }
  0x20   : > { %v226_v37 = vld [vmem:[%s1466_s28 + $0x20] sm:$0xff]  ;;  %v228_v39 = vld [vmem:[%s1466_s28 + $0x30] sm:$0xff]  ;;  %s1247_s21 = sshll.u32 %s1306_s17, 4  ;;  %s1248_s21 = int_to_ptr.vmem [resolvable:$false] %s1247_s21 }
  0x21   : > { %s1249_s22 = scalar_lea.vmem %s1248_s21, 256  ;;  %p1250_p0 = scmp.lt.s32.totalorder %s957_s5, %s1248_s21 }
  0x22   : > { %p1251_p1 = scmp.lt.s32.totalorder %s1249_s22, %s1243_s16 }
  0x23   : > { %252 = vmax.xlane.f32.xlu0 %v251_v11  ;;  %255 = vmax.xlane.f32.xlu1 %v254_v12 }
  0x24   : > { %p1252_p2 = por %p1251_p1, %p1250_p0 }
  0x26   : > { %p1253_p3 = pnand %p1252_p2, %p1246_p13 }
  0x27   : > { %258 = vmax.xlane.f32.xlu0 %v257_v15  ;;  %261 = vmax.xlane.f32.xlu1 %v260_v16 }
  0x2b   : > { %264 = vmax.xlane.f32.xlu0 %v263_v19  ;;  %267 = vmax.xlane.f32.xlu1 %v266_v20 }
  0x2f   : > { %270 = vmax.xlane.f32.xlu0 %v269_v23  ;;  %273 = vmax.xlane.f32.xlu1 %v272_v24 }
  0x33   : > { %276 = vmax.xlane.f32.xlu0 %v275_v27  ;;  %279 = vmax.xlane.f32.xlu1 %v278_v28 }
  0x37   : > { %282 = vmax.xlane.f32.xlu0 %v281_v31  ;;  %285 = vmax.xlane.f32.xlu1 %v284_v32 }
  0x48   : > { %693 = vperm.xlu1 %1082, %v223_v33  }
  0x4c   : > { %696 = vperm.xlu1 %1082, %v224_v34  }
  0x4d   : > { %690 = vperm.xlu0 %1081, %v222_v35  }
  0x50   : > { %699 = vperm.xlu1 %1082, %v225_v36  }
  0x54   : > { %702 = vperm.xlu1 %1082, %v226_v37  }
  0x58   : > { %705 = vperm.xlu1 %1082, %v227_v38  }
  0x5c   : > { %708 = vperm.xlu1 %1082, %v228_v39  }
  0xa4   : > { %v241_v40 = vpop.xlane.xlu0 %240  ;;  %v247_v41 = vpop.xlane.xlu1 %246 }
  0xa5   : > { %v1476_v42 = vsub.f32 %v1382_v1, %v241_v40  ;;  %v1479_v43 = vsub.f32 %v1385_v2, %v247_v41 }
  0xa7   : > { %v303_v44 = vmul.f32 1.442695, %v1476_v42  ;;  %v307_v45 = vmul.f32 1.442695, %v1479_v43 }
  0xa8   : > { %v244_v46 = vpop.xlane.xlu0 %243  ;;  %v250_v47 = vpop.xlane.xlu1 %249 }
  0xa9   : > { %1083 = vpow2.f32 %v303_v44  ;;  %v1484_v48 = vsub.f32 %v1388_v3, %v244_v46  ;;  %v1487_v49 = vsub.f32 %v1395_v6, %v250_v47 }
  0xaa   : > { %1085 = vpow2.f32 %v307_v45 }
  0xab   : > { %v305_v50 = vmul.f32 1.442695, %v1484_v48  ;;  %v309_v51 = vmul.f32 1.442695, %v1487_v49 }
  0xac   : > { %v253_v52 = vpop.xlane.xlu0 %252  ;;  %v256_v53 = vpop.xlane.xlu1 %255 }
  0xad   : > { %1087 = vpow2.f32 %v305_v50  ;;  %v1492_v54 = vsub.f32 %v1402_v9, %v253_v52  ;;  %v1495_v55 = vsub.f32 %v1405_v10, %v256_v53 }
  0xae   : > { %1089 = vpow2.f32 %v309_v51 }
  0xaf   : > { %v311_v56 = vmul.f32 1.442695, %v1492_v54  ;;  %v313_v57 = vmul.f32 1.442695, %v1495_v55 }
  0xb0   : > { %v259_v58 = vpop.xlane.xlu0 %258  ;;  %v262_v59 = vpop.xlane.xlu1 %261 }
  0xb1   : > { %1091 = vpow2.f32 %v311_v56  ;;  %v1500_v60 = vsub.f32 %v1412_v13, %v259_v58  ;;  %v1503_v61 = vsub.f32 %v1415_v14, %v262_v59 }
  0xb2   : > { %1093 = vpow2.f32 %v313_v57 }
  0xb3   : > { %v315_v62 = vmul.f32 1.442695, %v1500_v60  ;;  %v317_v63 = vmul.f32 1.442695, %v1503_v61 }
  0xb4   : > { %v265_v0 = vpop.xlane.xlu0 %264  ;;  %v268_v1 = vpop.xlane.xlu1 %267 }
  0xb5   : > { %1095 = vpow2.f32 %v315_v62  ;;  %v1508_v2 = vsub.f32 %v1422_v17, %v265_v0  ;;  %v1511_v3 = vsub.f32 %v1425_v18, %v268_v1  ;;  %v229_v0 = vld [vmem:[%s1466_s28 + $0x38] sm:$0xff]  ;;  %v231_v1 = vld [vmem:[%s1466_s28 + $0x48] sm:$0xff] }
  0xb6   : > { %v1513_v4 = vpop.eup %1083  ;;  %1097 = vpow2.f32 %v317_v63 }
  0xb7   : > { %v1515_v5 = vpop.eup %1085  ;;  %v319_v6 = vmul.f32 1.442695, %v1508_v2  ;;  %v321_v7 = vmul.f32 1.442695, %v1511_v3  ;;  %v335_v8 = vsel %vm238_vm0, %v1513_v4, 0.0 }
  0xb8   : > { %336 = vadd.xlane.f32.xlu0 %v335_v8  ;;  %v271_v9 = vpop.xlane.xlu0 %270  ;;  %v274_v10 = vpop.xlane.xlu1 %273  ;;  %v341_v13 = vsel %vm238_vm0, %v1515_v5, 0.0  ;;  %v232_v8 = vld [vmem:[%s1466_s28 + $0x50] sm:$0xff] }
  0xb9   : > { %1099 = vpow2.f32 %v319_v6  ;;  %v1522_v11 = vsub.f32 %v1432_v21, %v271_v9  ;;  %v1525_v12 = vsub.f32 %v1435_v22, %v274_v10  ;;  %v230_v6 = vld [vmem:[%s1466_s28 + $0x40] sm:$0xff]  ;;  %v235_v9 = vld [vmem:[%s1466_s28 + $0x68] sm:$0xff] }
  0xba   : > { %v1529_v14 = vpop.eup %1087  ;;  %1101 = vpow2.f32 %v321_v7  ;;  %v233_v7 = vld [vmem:[%s1466_s28 + $0x58] sm:$0xff]  ;;  %v234_v10 = vld [vmem:[%s1466_s28 + $0x60] sm:$0xff] }
  0xbb   : > { %v1531_v15 = vpop.eup %1089  ;;  %v323_v16 = vmul.f32 1.442695, %v1522_v11  ;;  %v325_v17 = vmul.f32 1.442695, %v1525_v12  ;;  %v338_v18 = vsel %vm238_vm0, %v1529_v14, 0.0 }
  0xbc   : > { %342 = vadd.xlane.f32.xlu0 %v341_v13  ;;  %339 = vadd.xlane.f32.xlu1 %v338_v18  ;;  %v277_v19 = vpop.xlane.xlu0 %276  ;;  %v280_v20 = vpop.xlane.xlu1 %279  ;;  %v344_v23 = vsel %vm238_vm0, %v1531_v15, 0.0  ;;  %v237_v13 = vld [vmem:[%s1466_s28 + $0x78] sm:$0xff] }
  0xbd   : > { %1103 = vpow2.f32 %v323_v16  ;;  %v1538_v21 = vsub.f32 %v1442_v25, %v277_v19  ;;  %v1541_v22 = vsub.f32 %v1445_v26, %v280_v20  ;;  %v236_v16 = vld [vmem:[%s1466_s28 + $0x70] sm:$0xff] }
  0xbe   : > { %v1545_v24 = vpop.eup %1091  ;;  %1105 = vpow2.f32 %v325_v17 }
  0xbf   : > { %2089 = vst [vmem:[#allocation5_spill] sm:$0xff] %v1541_v22  ;;  %v1547_v27 = vpop.eup %1093  ;;  %v327_v28 = vmul.f32 1.442695, %v1538_v21  ;;  %v329_v31 = vmul.f32 1.442695, %v1541_v22  ;;  %v347_v32 = vsel %vm238_vm0, %v1545_v24, 0.0 }
  0xc0   : > { %345 = vadd.xlane.f32.xlu1 %v344_v23  ;;  %348 = vadd.xlane.f32.xlu0 %v347_v32  ;;  %v283_v25 = vpop.xlane.xlu0 %282  ;;  %v286_v26 = vpop.xlane.xlu1 %285  ;;  %v350_v35 = vsel %vm238_vm0, %v1547_v27, 0.0 }
  0xc1   : > { %1107 = vpow2.f32 %v327_v28  ;;  %v1554_v33 = vsub.f32 %v1452_v29, %v283_v25  ;;  %v1557_v34 = vsub.f32 %v1455_v30, %v286_v26 }
  0xc2   : > { %v1561_v36 = vpop.eup %1095  ;;  %1109 = vpow2.f32 %v329_v31 }
  0xc3   : > { %2090 = vst [vmem:[#allocation6_spill] sm:$0xff] %v1554_v33  ;;  %2091 = vst [vmem:[#allocation7_spill] sm:$0xff] %v1557_v34  ;;  %v1563_v37 = vpop.eup %1097  ;;  %v331_v38 = vmul.f32 1.442695, %v1554_v33  ;;  %v333_v39 = vmul.f32 1.442695, %v1557_v34 }
  0xc4   : > { %v353_v40 = vsel %vm238_vm0, %v1561_v36, 0.0  ;;  %351 = vadd.xlane.f32.xlu1 %v350_v35  ;;  %v356_v29 = vsel %vm238_vm0, %v1563_v37, 0.0  ;;  %v1612_v17 = vpop.permute.xlu1 %693 }
  0xc5   : > { %354 = vadd.xlane.f32.xlu0 %v353_v40  ;;  %1111 = vpow2.f32 %v331_v38 }
  0xc6   : > { %v1571_v30 = vpop.eup %1099  ;;  %1113 = vpow2.f32 %v333_v39 }
  0xc7   : > { %v1573_v41 = vpop.eup %1101  ;;  %v359_v44 = vsel %vm238_vm0, %v1571_v30, 0.0 }
  0xc8   : > { %357 = vadd.xlane.f32.xlu1 %v356_v29  ;;  %v362_v45 = vsel %vm238_vm0, %v1573_v41, 0.0  ;;  %v1614_v18 = vpop.permute.xlu1 %696  ;;  %v1622_v28 = vpop.permute.xlu0 %690 }
  0xc9   : > { %360 = vadd.xlane.f32.xlu0 %v359_v44  ;;  %2093 = vst [vmem:[#allocation9_spill] sm:$0xff] %v1622_v28 }
  0xca   : > { %v1579_v46 = vpop.eup %1103 }
  0xcb   : > { %v1581_v47 = vpop.eup %1105  ;;  %v365_v50 = vsel %vm238_vm0, %v1579_v46, 0.0 }
  0xcc   : > { %363 = vadd.xlane.f32.xlu1 %v362_v45  ;;  %v368_v51 = vsel %vm238_vm0, %v1581_v47, 0.0  ;;  %v1616_v19 = vpop.permute.xlu1 %699 }
  0xcd   : > { %366 = vadd.xlane.f32.xlu0 %v365_v50 }
  0xce   : > { %v1587_v52 = vpop.eup %1107 }
  0xcf   : > { %v1589_v53 = vpop.eup %1109  ;;  %v371_v56 = vsel %vm238_vm0, %v1587_v52, 0.0 }
  0xd0   : > { %369 = vadd.xlane.f32.xlu1 %v368_v51  ;;  %v374_v57 = vsel %vm238_vm0, %v1589_v53, 0.0  ;;  %v1618_v20 = vpop.permute.xlu1 %702 }
  0xd1   : > { %372 = vadd.xlane.f32.xlu0 %v371_v56 }
  0xd2   : > { %v1595_v58 = vpop.eup %1111 }
  0xd3   : > { %v1597_v59 = vpop.eup %1113  ;;  %v377_v62 = vsel %vm238_vm0, %v1595_v58, 0.0 }
  0xd4   : > { %375 = vadd.xlane.f32.xlu1 %v374_v57  ;;  %v380_v63 = vsel %vm238_vm0, %v1597_v59, 0.0  ;;  %v1620_v23 = vpop.permute.xlu1 %705 }
  0xd5   : > { %378 = vadd.xlane.f32.xlu0 %v377_v62  ;;  %2092 = vst [vmem:[#allocation8_spill] sm:$0xff] %v1620_v23 }
  0xd8   : > { %381 = vadd.xlane.f32.xlu1 %v380_v63  ;;  %v1624_v31 = vpop.permute.xlu1 %708 }
  0xd9   : > { %2094 = vst [vmem:[#allocation10_spill] sm:$0xff] %v1624_v31 }
  0xe9   : > { %711 = vperm.xlu1 %1082, %v229_v0  }
  0xeb   : > { %717 = vperm.xlu0 %1081, %v231_v1  }
  0xed   : > { %714 = vperm.xlu1 %1082, %v230_v6  }
  0xef   : > { %723 = vperm.xlu0 %1081, %v233_v7  }
  0xf1   : > { %720 = vperm.xlu1 %1082, %v232_v8  }
  0xf3   : > { %729 = vperm.xlu0 %1081, %v235_v9  }
  0xf5   : > { %726 = vperm.xlu1 %1082, %v234_v10  }
  0xf7   : > { %735 = vperm.xlu0 %1081, %v237_v13  }
  0xf9   : > { %732 = vperm.xlu1 %1082, %v236_v16  }
 0x141   : > { %v337_v32 = vpop.xlane.xlu0 %336 }
 0x142   : > { %1115 = vrcp.f32 %v337_v32 }
 0x145   : > { %v340_v25 = vpop.xlane.xlu1 %339  ;;  %v343_v26 = vpop.xlane.xlu0 %342 }
 0x146   : > { %1117 = vrcp.f32 %v340_v25 }
 0x147   : > { %1119 = vrcp.f32 %v343_v26 }
 0x149   : > { %v346_v35 = vpop.xlane.xlu1 %345  ;;  %v349_v38 = vpop.xlane.xlu0 %348 }
 0x14a   : > { %1121 = vrcp.f32 %v346_v35 }
 0x14b   : > { %1123 = vrcp.f32 %v349_v38 }
 0x14d   : > { %v352_v39 = vpop.xlane.xlu1 %351 }
 0x14e   : > { %v355_v40 = vpop.xlane.xlu0 %354  ;;  %1125 = vrcp.f32 %v352_v39 }
 0x14f   : > { %1127 = vlog2.f32 %v337_v32  ;;  %v1116_v45 = vpop.eup %1115 }
 0x150   : > { %1129 = vlog2.f32 %v340_v25  ;;  %v447_v62 = vmul.f32 %v1116_v45, %v1513_v4 }
 0x151   : > { %v358_v29 = vpop.xlane.xlu1 %357 }
 0x152   : > { %v361_v44 = vpop.xlane.xlu0 %360  ;;  %1131 = vrcp.f32 %v358_v29  ;;  %v463_v10 = vsub.f32 1.0, %v447_v62 }
 0x153   : > { %1133 = vlog2.f32 %v343_v26  ;;  %v1118_v51 = vpop.eup %1117 }
 0x154   : > { %1135 = vrcp.f32 %v355_v40  ;;  %v1120_v56 = vpop.eup %1119  ;;  %v448_v0 = vmul.f32 %v1118_v51, %v1529_v14 }
 0x155   : > { %v364_v50 = vpop.xlane.xlu1 %363  ;;  %1137 = vlog2.f32 %v346_v35  ;;  %v449_v7 = vmul.f32 %v1120_v56, %v1515_v5  ;;  %v1632_v35 = vmax.f32 %v463_v10, 0.0 }
 0x156   : > { %1139 = vlog2.f32 %v349_v38  ;;  %v367_v63 = vpop.xlane.xlu0 %366  ;;  %v464_v13 = vsub.f32 1.0, %v448_v0 }
 0x157   : > { %v1122_v57 = vpop.eup %1121  ;;  %1141 = vlog2.f32 %v352_v39  ;;  %v465_v25 = vsub.f32 1.0, %v449_v7  ;;  %vm497_vm1 = vcmp.eq.f32.partialorder %v1632_v35, inf  ;;  %vm499_vm2 = vcmp.eq.f32.partialorder %v1632_v35, 0.0 }
 0x158   : > { %1143 = vrcp.f32 %v361_v44  ;;  %v450_v1 = vmul.f32 %v1122_v57, %v1531_v15  ;;  %v1124_v6 = vpop.eup %1123  ;;  %v1634_v45 = vmax.f32 %v464_v13, 0.0 }
 0x159   : > { %1145 = vrcp.f32 %v364_v50  ;;  %v370_v8 = vpop.xlane.xlu1 %369  ;;  %v451_v15 = vmul.f32 %v1124_v6, %v1545_v24  ;;  %v1639_v56 = vmax.f32 %v465_v25, 0.0 }
 0x15a   : > { %1147 = vrcp.f32 %v367_v63  ;;  %v466_v32 = vsub.f32 1.0, %v450_v1  ;;  %v373_v38 = vpop.xlane.xlu0 %372  ;;  %vm504_vm3 = vcmp.eq.f32.partialorder %v1634_v45, inf  ;;  %vm506_vm4 = vcmp.eq.f32.partialorder %v1634_v45, 0.0 }
 0x15b   : > { %v1126_v9 = vpop.eup %1125  ;;  %1149 = vlog2.f32 %v355_v40  ;;  %v467_v24 = vsub.f32 1.0, %v451_v15  ;;  %vm511_vm6 = vcmp.eq.f32.partialorder %v1639_v56, inf  ;;  %vm513_vm8 = vcmp.eq.f32.partialorder %v1639_v56, 0.0 }
 0x15c   : > { %v452_v16 = vmul.f32 %v1126_v9, %v1547_v27  ;;  %1151 = vlog2.f32 %v358_v29  ;;  %v1128_v4 = vpop.eup %1127  ;;  %v1636_v27 = vmax.f32 %v466_v32, 0.0 }
 0x15d   : > { %1153 = vrcp.f32 %v370_v8  ;;  %v1130_v14 = vpop.eup %1129  ;;  %v1641_v62 = vmul.f32 0.6931472, %v1128_v4  ;;  %v1655_v10 = vmax.f32 %v467_v24, 0.0  ;;  %v1657_v13 = vpop.xlane.xlu1 %375 }
 0x15e   : > { %v468_v5 = vsub.f32 1.0, %v452_v16  ;;  %1155 = vlog2.f32 %v361_v44  ;;  %v1643_v44 = vmul.f32 0.6931472, %v1130_v14  ;;  %vm518_vm5 = vcmp.eq.f32.partialorder %v1636_v27, inf }
 0x15f   : > { %v1132_v26 = vpop.eup %1131  ;;  %1157 = vlog2.f32 %v364_v50  ;;  %vm520_vm7 = vcmp.eq.f32.partialorder %v1636_v27, 0.0  ;;  %vm525_vm11 = vcmp.eq.f32.partialorder %v1655_v10, inf  ;;  %vm527_vm12 = vcmp.eq.f32.partialorder %v1655_v10, 0.0 }
 0x160   : > { %v1134_v39 = vpop.eup %1133  ;;  %v454_v29 = vmul.f32 %v1132_v26, %v1563_v37  ;;  %1159 = vlog2.f32 %v367_v63  ;;  %v1645_v0 = vmax.f32 %v468_v5, 0.0 }
 0x161   : > { %v1136_v40 = vpop.eup %1135  ;;  %1161 = vrcp.f32 %v373_v38  ;;  %v1651_v7 = vmul.f32 0.6931472, %v1134_v39 }
 0x162   : > { %v1138_v51 = vpop.eup %1137  ;;  %1163 = vrsqrt.f32 %v1632_v35  ;;  %v453_v1 = vmul.f32 %v1136_v40, %v1561_v36  ;;  %v470_v63 = vsub.f32 1.0, %v454_v29  ;;  %vm532_vm9 = vcmp.eq.f32.partialorder %v1645_v0, inf }
 0x163   : > { %v1140_v57 = vpop.eup %1139  ;;  %1165 = vrsqrt.f32 %v1634_v45  ;;  %v1653_v9 = vmul.f32 0.6931472, %v1138_v51  ;;  %vm534_vm10 = vcmp.eq.f32.partialorder %v1645_v0, 0.0  ;;  %v535_v34 = vand.u32 2147483648, %v1645_v0 }
 0x164   : > { %v1142_v50 = vpop.eup %1141  ;;  %1167 = vrsqrt.f32 %v1636_v27  ;;  %v469_v25 = vsub.f32 1.0, %v453_v1  ;;  %v1667_v39 = vmul.f32 0.6931472, %v1140_v57  ;;  %v1669_v40 = vmax.f32 %v470_v63, 0.0 }
 0x165   : > { %v1144_v37 = vpop.eup %1143  ;;  %1169 = vrsqrt.f32 %v1639_v56 }
 0x166   : > { %v1146_v6 = vpop.eup %1145  ;;  %1171 = vrsqrt.f32 %v1645_v0  ;;  %v455_v15 = vmul.f32 %v1144_v37, %v1571_v30  ;;  %v419_v23 = vsub.f32 %v1492_v54, %v1667_v39  ;;  %vm546_vm13 = vcmp.eq.f32.partialorder %v1669_v40, inf }
 0x167   : > { %v1148_v16 = vpop.eup %1147  ;;  %1173 = vlog2.f32 %v370_v8  ;;  %v456_v29 = vmul.f32 %v1146_v6, %v1573_v41  ;;  %v1679_v8 = vmul.f32 0.6931472, %v1142_v50  ;;  %v1684_v41 = vpop.xlane.xlu0 %378  ;;  %v507_v50 = vand.u32 2147483648, %v1634_v45 }
 0x168   : > { %v1150_v14 = vpop.eup %1149  ;;  %1175 = vlog2.f32 %v373_v38  ;;  %v457_v24 = vmul.f32 %v1148_v16, %v1579_v46  ;;  %v1690_v38 = vmax.f32 %v469_v25, 0.0  ;;  %v471_v63 = vsub.f32 1.0, %v455_v15  ;;  %v1694_v6 = vpop.xlane.xlu1 %381 }
 0x169   : > { %v1152_v5 = vpop.eup %1151  ;;  %1177 = vrsqrt.f32 %v1655_v10  ;;  %v1681_v57 = vmul.f32 0.6931472, %v1150_v14  ;;  %v472_v14 = vsub.f32 1.0, %v456_v29  ;;  %vm548_vm14 = vcmp.eq.f32.partialorder %v1669_v40, 0.0 }
 0x16a   : > { %v1154_v51 = vpop.eup %1153  ;;  %1179 = vrcp.f32 %v1657_v13  ;;  %v1692_v37 = vmul.f32 0.6931472, %v1152_v5  ;;  %v473_v15 = vsub.f32 1.0, %v457_v24  ;;  %v521_v5 = vand.u32 2147483648, %v1636_v27 }
 0x16b   : > { %v1688_v46 = vpop.eup %1155  ;;  %v458_v4 = vmul.f32 %v1154_v51, %v1581_v47  ;;  %1181 = vrsqrt.f32 %v1669_v40  ;;  %v514_v47 = vand.u32 2147483648, %v1639_v56  ;;  %v1714_v1 = vmax.f32 %v471_v63, 0.0 }
 0x16c   : > { %v1698_v16 = vpop.eup %1157  ;;  %1183 = vrcp.f32 %v1684_v41  ;;  %v1719_v32 = vmax.f32 %v472_v14, 0.0  ;;  %v1723_v33 = vmax.f32 %v473_v15, 0.0  ;;  %vm539_vm15 = vcmp.eq.f32.partialorder %v1690_v38, inf }
 0x16d   : > { %v1704_v25 = vpop.eup %1159  ;;  %1185 = vrcp.f32 %v1694_v6  ;;  %v474_v36 = vsub.f32 1.0, %v458_v4 }
 0x16e   : > { %v1162_v30 = vpop.eup %1161  ;;  %1187 = vrsqrt.f32 %v1690_v38 }
 0x16f   : > { %v1164_v51 = vpop.eup %1163  ;;  %v1726_v63 = vmul.f32 %v1162_v30, %v1587_v52  ;;  %v2095_v52 = vand.u32 2147483648, %v1632_v35  ;;  %1189 = vrsqrt.f32 %v1719_v32 }
 0x170   : > { %v1166_v24 = vpop.eup %1165  ;;  %v496_v26 = vmul.f32 %v1164_v51, %v1632_v35  ;;  %1191 = vrsqrt.f32 %v1714_v1 }
 0x171   : > { %v1168_v31 = vpop.eup %1167  ;;  %v503_v29 = vmul.f32 %v1166_v24, %v1634_v45  ;;  %1193 = vrsqrt.f32 %v1723_v33 }
 0x172   : > { %v1170_v22 = vpop.eup %1169  ;;  %v498_v4 = vsel %vm497_vm1, %v1632_v35, %v496_v26  ;;  %v517_v14 = vmul.f32 %v1168_v31, %v1636_v27  ;;  %v528_v26 = vand.u32 2147483648, %v1655_v10  ;;  %v1748_v31 = vmax.f32 %v474_v36, 0.0 }
 0x173   : > { %v1172_v15 = vpop.eup %1171  ;;  %v501_v30 = vsel %vm499_vm2, %v2095_v52, %v498_v4  ;;  %v505_v54 = vsel %vm504_vm3, %v1634_v45, %v503_v29  ;;  %v510_v39 = vmul.f32 %v1170_v22, %v1639_v56  ;;  %v2096_v45 = vsub.f32 %v1476_v42, %v1641_v62 }
 0x174   : > { %v1746_v51 = vpop.eup %1173  ;;  %v607_v24 = vsub.f32 0.0, %v501_v30  ;;  %v508_v28 = vsel %vm506_vm4, %v507_v50, %v505_v54  ;;  %v519_v35 = vsel %vm518_vm5, %v1636_v27, %v517_v14  ;;  %v531_v36 = vmul.f32 %v1172_v15, %v1645_v0 }
 0x175   : > { %v1755_v4 = vpop.eup %1175  ;;  %v608_v52 = vsub.f32 0.0, %v508_v28  ;;  %v522_v22 = vsel %vm520_vm7, %v521_v5, %v519_v35  ;;  %v512_v29 = vsel %vm511_vm6, %v1639_v56, %v510_v39  ;;  %v2097_v27 = vsub.f32 %v1484_v48, %v1643_v44 }
 0x176   : > { %v1178_v30 = vpop.eup %1177  ;;  %v1766_v50 = vmul.f32 %v607_v24, %v2096_v45  ;;  %v610_v54 = vsub.f32 0.0, %v522_v22  ;;  %v515_v14 = vsel %vm513_vm8, %v514_v47, %v512_v29  ;;  %v533_v15 = vsel %vm532_vm9, %v1645_v0, %v531_v36 }
 0x177   : > { %v1180_v28 = vpop.eup %1179  ;;  %v1774_v5 = vmul.f32 %v608_v52, %v2097_v27  ;;  %v609_v39 = vsub.f32 0.0, %v515_v14  ;;  %v524_v42 = vmul.f32 %v1178_v30, %v1655_v10  ;;  %v475_v62 = vsub.f32 1.0, %v1726_v63 }
 0x178   : > { %v639_v56 = vsel %vm238_vm0, %v1766_v50, 0.0  ;;  %v2098_v47 = vsub.f32 %v1487_v49, %v1653_v9  ;;  %v536_v48 = vsel %vm534_vm10, %v535_v34, %v533_v15  ;;  %v1182_v44 = vpop.eup %1181  ;;  %v2099_v52 = vsub.f32 %v1479_v43, %v1651_v7 }
 0x179   : > { %640 = vadd.xlane.f32.xlu1 %v639_v56  ;;  %v642_v35 = vsel %vm238_vm0, %v1774_v5, 0.0  ;;  %v612_v22 = vsub.f32 0.0, %v536_v48  ;;  %v526_v49 = vsel %vm525_vm11, %v1655_v10, %v524_v42  ;;  %v1184_v9 = vpop.eup %1183  ;;  %v460_v29 = vmul.f32 %v1180_v28, %v1589_v53 }
 0x17a   : > { %v1786_v24 = vmul.f32 %v610_v54, %v2098_v47  ;;  %v1795_v63 = vmul.f32 %v609_v39, %v2099_v52  ;;  %643 = vadd.xlane.f32.xlu0 %v642_v35  ;;  %v529_v0 = vsel %vm527_vm12, %v528_v26, %v526_v49  ;;  %v545_v36 = vmul.f32 %v1182_v44, %v1669_v40  ;;  %v1186_v43 = vpop.eup %1185 }
 0x17b   : > { %v2100_v7 = vsub.f32 %v1495_v55, %v1679_v8  ;;  %v611_v45 = vsub.f32 0.0, %v529_v0  ;;  %v549_v53 = vand.u32 2147483648, %v1669_v40  ;;  %v1188_v54 = vpop.eup %1187  ;;  %v422_v14 = vsub.f32 %v1503_v61, %v1692_v37 }
 0x17c   : > { %v648_v34 = vsel %vm238_vm0, %v1786_v24, 0.0  ;;  %v547_v10 = vsel %vm546_vm13, %v1669_v40, %v545_v36  ;;  %v645_v55 = vsel %vm238_vm0, %v1795_v63, 0.0  ;;  %v538_v28 = vmul.f32 %v1188_v54, %v1690_v38  ;;  %v1190_v44 = vpop.eup %1189 }
 0x17d   : > { %v1809_v30 = vmul.f32 %v612_v22, %v2100_v7  ;;  %649 = vadd.xlane.f32.xlu1 %v648_v34  ;;  %v1820_v8 = vmul.f32 %v611_v45, %v419_v23  ;;  %v550_v26 = vsel %vm548_vm14, %v549_v53, %v547_v10  ;;  %v542_v40 = vand.u32 2147483648, %v1690_v38  ;;  %v1192_v45 = vpop.eup %1191 }
 0x17e   : > { %646 = vadd.xlane.f32.xlu0 %v645_v55  ;;  %v614_v61 = vsub.f32 0.0, %v550_v26  ;;  %v1827_v37 = vmax.f32 %v475_v62, 0.0  ;;  %v461_v39 = vmul.f32 %v1184_v9, %v1595_v58  ;;  %v540_v15 = vsel %vm539_vm15, %v1690_v38, %v538_v28 }
 0x17f   : > { %v654_v27 = vsel %vm238_vm0, %v1809_v30, 0.0  ;;  %vm541_vm1 = vcmp.eq.f32.partialorder %v1690_v38, 0.0  ;;  %v476_v23 = vsub.f32 1.0, %v460_v29  ;;  %v462_v47 = vmul.f32 %v1186_v43, %v1597_v59 }
 0x180   : > { %v1832_v42 = vmul.f32 %v614_v61, %v422_v14  ;;  %v543_v56 = vsel %vm541_vm1, %v542_v40, %v540_v15  ;;  %v651_v48 = vsel %vm238_vm0, %v1820_v8, 0.0  ;;  %v421_v62 = vsub.f32 %v1500_v60, %v1681_v57 }
 0x181   : > { %655 = vadd.xlane.f32.xlu1 %v654_v27  ;;  %v613_v58 = vsub.f32 0.0, %v543_v56  ;;  %1195 = vrsqrt.f32 %v1748_v31  ;;  %v2101_v35 = vlaneseq  ;;  %v477_v22 = vsub.f32 1.0, %v461_v39 }
 0x182   : > { %652 = vadd.xlane.f32.xlu0 %v651_v48  ;;  %v660_v38 = vsel %vm238_vm0, %v1832_v42, 0.0  ;;  %v402_v49 = vmul.f32 0.6931472, %v1698_v16  ;;  %v1849_v9 = vmax.f32 %v476_v23, 0.0  ;;  %v559_v60 = vmul.f32 %v1190_v44, %v1719_v32 }
 0x183   : > { %v1844_v52 = vand.u32 127, %v2101_v35  ;;  %v1846_v59 = vmul.f32 %v613_v58, %v421_v62  ;;  %1197 = vrsqrt.f32 %v1827_v37  ;;  %v478_v57 = vsub.f32 1.0, %v462_v47 }
 0x184   : > { %vm560_vm2 = vcmp.eq.f32.partialorder %v1719_v32, inf  ;;  %v563_v34 = vand.u32 2147483648, %v1719_v32  ;;  %vm562_vm3 = vcmp.eq.f32.partialorder %v1719_v32, 0.0  ;;  %v1859_v16 = vmax.f32 %v477_v22, 0.0 }
 0x185   : > { %661 = vadd.xlane.f32.xlu1 %v660_v38  ;;  %v657_v29 = vsel %vm238_vm0, %v1846_v59, 0.0  ;;  %v561_v0 = vsel %vm560_vm2, %v1719_v32, %v559_v60  ;;  %v424_v43 = vsub.f32 %v1511_v3, %v402_v49  ;;  %1199 = vrsqrt.f32 %v1849_v9 }
 0x186   : > { %658 = vadd.xlane.f32.xlu0 %v657_v29  ;;  %v564_v36 = vsel %vm562_vm3, %v563_v34, %v561_v0  ;;  %vm738_vm4 = vcmp.eq.s32.totalorder %v1844_v52, %v1612_v17  ;;  %1201 = vlog2.f32 %v1657_v13  ;;  %v1866_v53 = vmax.f32 %v478_v57, 0.0 }
 0x187   : > { %v616_v7 = vsub.f32 0.0, %v564_v36  ;;  %v400_v54 = vmul.f32 0.6931472, %v1688_v46  ;;  %1203 = vlog2.f32 %v1684_v41  ;;  %v552_v14 = vmul.f32 %v1192_v45, %v1714_v1  ;;  %v1194_v41 = vpop.eup %1193 }
 0x188   : > { %v404_v3 = vmul.f32 0.6931472, %v1704_v25  ;;  %vm553_vm5 = vcmp.eq.f32.partialorder %v1714_v1, inf  ;;  %v556_v10 = vand.u32 2147483648, %v1714_v1  ;;  %1205 = vrsqrt.f32 %v1859_v16 }
 0x189   : > { %v1870_v32 = vmul.f32 %v616_v7, %v424_v43  ;;  %1207 = vlog2.f32 %v1694_v6  ;;  %v554_v46 = vsel %vm553_vm5, %v1714_v1, %v552_v14  ;;  %vm555_vm6 = vcmp.eq.f32.partialorder %v1714_v1, 0.0 }
 0x18a   : > { %vm739_vm7 = vcmp.eq.s32.totalorder %v1844_v52, %v1614_v18  ;;  %v406_v25 = vmul.f32 0.6931472, %v1746_v51  ;;  %v557_v55 = vsel %vm555_vm6, %v556_v10, %v554_v46  ;;  %1209 = vrsqrt.f32 %v1866_v53 }
 0x18b   : > { %v666_v13 = vsel %vm238_vm0, %v1870_v32, 0.0  ;;  %v408_v26 = vmul.f32 0.6931472, %v1755_v4  ;;  %v423_v6 = vsub.f32 %v1508_v2, %v400_v54  ;;  %v615_v28 = vsub.f32 0.0, %v557_v55 }
 0x18c   : > { %667 = vadd.xlane.f32.xlu1 %v666_v13  ;;  %v566_v27 = vmul.f32 %v1194_v41, %v1723_v33  ;;  %v754_v1 = vsel %vm738_vm4, %v1774_v5, 0.0  ;;  %v425_v40 = vsub.f32 %v1522_v11, %v404_v3  ;;  %vm567_vm8 = vcmp.eq.f32.partialorder %v1723_v33, inf }
 0x18d   : > { %v570_v51 = vand.u32 2147483648, %v1723_v33  ;;  %v1896_v39 = vmul.f32 %v615_v28, %v423_v6  ;;  %vm569_vm9 = vcmp.eq.f32.partialorder %v1723_v33, 0.0  ;;  %vm574_vm10 = vcmp.eq.f32.partialorder %v1748_v31, inf  ;;  %v712_v28 = vpop.permute.xlu1 %711 }
 0x18e   : > { %v1196_v61 = vpop.eup %1195  ;;  %v568_v4 = vsel %vm567_vm8, %v1723_v33, %v566_v27  ;;  %vm576_vm11 = vcmp.eq.f32.partialorder %v1748_v31, 0.0  ;;  %v577_v11 = vand.u32 2147483648, %v1748_v31  ;;  %v426_v33 = vsub.f32 %v1525_v12, %v406_v25  ;;  %v2102_v25 = vld [vmem:[#allocation9_spill] sm:$0xff] }
 0x18f   : > { %v573_v2 = vmul.f32 %v1196_v61, %v1748_v31  ;;  %v571_v23 = vsel %vm569_vm9, %v570_v51, %v568_v4  ;;  %v663_v17 = vsel %vm238_vm0, %v1896_v39, 0.0  ;;  %vm581_vm12 = vcmp.eq.f32.partialorder %v1827_v37, inf  ;;  %v2104_v4 = vld [vmem:[#allocation8_spill] sm:$0xff] }
 0x190   : > { %v1198_v15 = vpop.eup %1197  ;;  %v617_v5 = vsub.f32 0.0, %v571_v23  ;;  %664 = vadd.xlane.f32.xlu0 %v663_v17  ;;  %v584_v62 = vand.u32 2147483648, %v1827_v37  ;;  %vm583_vm13 = vcmp.eq.f32.partialorder %v1827_v37, 0.0  ;;  %v755_v12 = vsel %vm739_vm7, %v1795_v63, 0.0 }
 0x191   : > { %v575_v56 = vsel %vm574_vm10, %v1748_v31, %v573_v2  ;;  %v580_v47 = vmul.f32 %v1198_v15, %v1827_v37  ;;  %v772_v31 = vsel %vm238_vm0, %v754_v1, 0.0  ;;  %vm588_vm14 = vcmp.eq.f32.partialorder %v1849_v9, inf  ;;  %v2103_v1 = vld [vmem:[#allocation5_spill] sm:$0xff] }
 0x192   : > { %v578_v48 = vsel %vm576_vm11, %v577_v11, %v575_v56  ;;  %v1911_v58 = vmul.f32 %v617_v5, %v425_v40  ;;  %v1200_v22 = vpop.eup %1199  ;;  %v427_v43 = vsub.f32 %v1538_v21, %v408_v26  ;;  %vm740_vm15 = vcmp.eq.s32.totalorder %v1844_v52, %v1616_v19  ;;  %v2105_v5 = vld [vmem:[#allocation6_spill] sm:$0xff] }
 0x193   : > { %v618_v38 = vsub.f32 0.0, %v578_v48  ;;  %v582_v44 = vsel %vm581_vm12, %v1827_v37, %v580_v47  ;;  %v1202_v60 = vpop.eup %1201  ;;  %v587_v0 = vmul.f32 %v1200_v22, %v1849_v9  ;;  %v775_v7 = vsel %vm238_vm0, %v755_v12, 0.0  ;;  %v2106_v47 = vld [vmem:[#allocation10_spill] sm:$0xff]  ;;  %v715_v48 = vpop.permute.xlu1 %714 }
 0x194   : > { %v585_v49 = vsel %vm583_vm13, %v584_v62, %v582_v44  ;;  %v669_v57 = vsel %vm238_vm0, %v1911_v58, 0.0  ;;  %v1204_v36 = vpop.eup %1203  ;;  %773 = vadd.xlane.f32.xlu0 %v772_v31  ;;  %v591_v45 = vand.u32 2147483648, %v1849_v9  ;;  %v756_v10 = vsel %vm740_vm15, %v1786_v24, 0.0 }
 0x195   : > { %v1922_v29 = vmul.f32 %v618_v38, %v426_v33  ;;  %v619_v34 = vsub.f32 0.0, %v585_v49  ;;  %670 = vadd.xlane.f32.xlu1 %v669_v57  ;;  %v1206_v37 = vpop.eup %1205  ;;  %v589_v18 = vsel %vm588_vm14, %v1849_v9, %v587_v0  ;;  %vm590_vm1 = vcmp.eq.f32.partialorder %v1849_v9, 0.0  ;;  %v718_v33 = vpop.permute.xlu0 %717 }
 0x196   : > { %v1208_v63 = vpop.eup %1207  ;;  %v594_v54 = vmul.f32 %v1206_v37, %v1859_v16  ;;  %v592_v21 = vsel %vm590_vm1, %v591_v45, %v589_v18  ;;  %vm595_vm2 = vcmp.eq.f32.partialorder %v1859_v16, inf  ;;  %v410_v19 = vmul.f32 0.6931472, %v1202_v60 }
 0x197   : > { %v1210_v14 = vpop.eup %1209  ;;  %v672_v3 = vsel %vm238_vm0, %v1922_v29, 0.0  ;;  %v1936_v13 = vmul.f32 %v619_v34, %v427_v43  ;;  %vm741_vm3 = vcmp.eq.s32.totalorder %v1844_v52, %v1618_v20  ;;  %vm737_vm4 = vcmp.eq.s32.totalorder %v1844_v52, %v2102_v25  ;;  %v721_v34 = vpop.permute.xlu1 %720 }
 0x198   : > { %776 = vadd.xlane.f32.xlu0 %v775_v7  ;;  %v596_v46 = vsel %vm595_vm2, %v1859_v16, %v594_v54  ;;  %v601_v41 = vmul.f32 %v1210_v14, %v1866_v53  ;;  %v778_v24 = vsel %vm238_vm0, %v756_v10, 0.0  ;;  %v598_v9 = vand.u32 2147483648, %v1859_v16 }
 0x199   : > { %673 = vadd.xlane.f32.xlu1 %v672_v3  ;;  %v675_v55 = vsel %vm238_vm0, %v1936_v13, 0.0  ;;  %v757_v26 = vsel %vm741_vm3, %v1820_v8, 0.0  ;;  %v620_v6 = vsub.f32 0.0, %v592_v21  ;;  %vm597_vm5 = vcmp.eq.f32.partialorder %v1859_v16, 0.0  ;;  %v724_v57 = vpop.permute.xlu0 %723 }
 0x19a   : > { %v753_v20 = vsel %vm737_vm4, %v1766_v50, 0.0  ;;  %v599_v27 = vsel %vm597_vm5, %v598_v9, %v596_v46  ;;  %vm602_vm6 = vcmp.eq.f32.partialorder %v1866_v53, inf  ;;  %v412_v61 = vmul.f32 0.6931472, %v1204_v36 }
 0x19b   : > { %v428_v40 = vsub.f32 %v2103_v1, %v410_v19  ;;  %v603_v51 = vsel %vm602_vm6, %v1866_v53, %v601_v41  ;;  %vm742_vm7 = vcmp.eq.s32.totalorder %v1844_v52, %v2104_v4  ;;  %v781_v8 = vsel %vm238_vm0, %v757_v26, 0.0 }
 0x19c   : > { %779 = vadd.xlane.f32.xlu0 %v778_v24  ;;  %v605_v16 = vand.u32 2147483648, %v1866_v53  ;;  %v769_v2 = vsel %vm238_vm0, %v753_v20, 0.0  ;;  %v621_v23 = vsub.f32 0.0, %v599_v27  ;;  %vm604_vm8 = vcmp.eq.f32.partialorder %v1866_v53, 0.0 }
 0x19d   : > { %676 = vadd.xlane.f32.xlu1 %v675_v55  ;;  %v636_v15 = vmul.f32 %v620_v6, %v428_v40  ;;  %v758_v50 = vsel %vm742_vm7, %v1809_v30, 0.0  ;;  %v414_v17 = vmul.f32 0.6931472, %v1208_v63  ;;  %v429_v56 = vsub.f32 %v2105_v5, %v412_v61  ;;  %v2107_v30 = vld [vmem:[#allocation7_spill] sm:$0xff]  ;;  %v730_v18 = vpop.permute.xlu0 %729  ;;  %v727_v63 = vpop.permute.xlu1 %726 }
 0x19e   : > { %v606_v11 = vsel %vm604_vm8, %v605_v16, %v603_v51  ;;  %vm743_vm9 = vcmp.eq.s32.totalorder %v1844_v52, %v2106_v47  ;;  %v784_v62 = vsel %vm238_vm0, %v758_v50, 0.0  ;;  %vm744_vm10 = vcmp.eq.s32.totalorder %v1844_v52, %v712_v28 }
 0x19f   : > { %v678_v38 = vsel %vm238_vm0, %v636_v15, 0.0  ;;  %v637_v44 = vmul.f32 %v621_v23, %v429_v56  ;;  %v622_v22 = vsub.f32 0.0, %v606_v11  ;;  %v759_v53 = vsel %vm743_vm9, %v1846_v59, 0.0 }
 0x1a0   : > { %782 = vadd.xlane.f32.xlu0 %v781_v8  ;;  %v430_v31 = vsub.f32 %v2107_v30, %v414_v17  ;;  %v787_v12 = vsel %vm238_vm0, %v759_v53, 0.0  ;;  %v760_v0 = vsel %vm744_vm10, %v1832_v42, 0.0  ;;  %vm746_vm11 = vcmp.eq.s32.totalorder %v1844_v52, %v718_v33 }
 0x1a1   : > { %770 = vadd.xlane.f32.xlu1 %v769_v2  ;;  %v681_v49 = vsel %vm238_vm0, %v637_v44, 0.0  ;;  %vm745_vm12 = vcmp.eq.s32.totalorder %v1844_v52, %v715_v48  ;;  %v790_v59 = vsel %vm238_vm0, %v760_v0, 0.0  ;;  %v762_v43 = vsel %vm746_vm11, %v1870_v32, 0.0  ;;  %v736_v14 = vpop.permute.xlu0 %735  ;;  %v733_v3 = vpop.permute.xlu1 %732 }
 0x1a2   : > { %v638_v60 = vmul.f32 %v622_v22, %v430_v31  ;;  %v761_v37 = vsel %vm745_vm12, %v1896_v39, 0.0  ;;  %vm748_vm13 = vcmp.eq.s32.totalorder %v1844_v52, %v724_v57  ;;  %vm747_vm14 = vcmp.eq.s32.totalorder %v1844_v52, %v721_v34 }
 0x1a3   : > { %v793_v42 = vsel %vm238_vm0, %v761_v37, 0.0  ;;  %v796_v7 = vsel %vm238_vm0, %v762_v43, 0.0  ;;  %v763_v45 = vsel %vm747_vm14, %v1911_v58, 0.0  ;;  %v764_v54 = vsel %vm748_vm13, %v1922_v29, 0.0 }
 0x1a4   : > { %785 = vadd.xlane.f32.xlu0 %v784_v62  ;;  %v684_v36 = vsel %vm238_vm0, %v638_v60, 0.0  ;;  %vm750_vm15 = vcmp.eq.s32.totalorder %v1844_v52, %v730_v18  ;;  %vm749_vm1 = vcmp.eq.s32.totalorder %v1844_v52, %v727_v63  ;;  %v799_v32 = vsel %vm238_vm0, %v763_v45, 0.0 }
 0x1a5   : > { %679 = vadd.xlane.f32.xlu1 %v678_v38  ;;  %v802_v39 = vsel %vm238_vm0, %v764_v54, 0.0  ;;  %v765_v10 = vsel %vm749_vm1, %v1936_v13, 0.0  ;;  %v766_v21 = vsel %vm750_vm15, %v636_v15, 0.0  ;;  %vm752_vm2 = vcmp.eq.s32.totalorder %v1844_v52, %v736_v14 }
 0x1a6   : > { %vm751_vm3 = vcmp.eq.s32.totalorder %v1844_v52, %v733_v3  ;;  %v805_v58 = vsel %vm238_vm0, %v765_v10, 0.0  ;;  %v808_v29 = vsel %vm238_vm0, %v766_v21, 0.0  ;;  %v768_v46 = vsel %vm752_vm2, %v638_v60, 0.0 }
 0x1a7   : > { %v767_v19 = vsel %vm751_vm3, %v637_v44, 0.0  ;;  %v814_v25 = vsel %vm238_vm0, %v768_v46, 0.0  ;;  %v1998_v1 = vshrl.u32 %v2101_v35, 7  ;;  %v2004_v2 = vstv %s1036_s29 }
 0x1a8   : > { %788 = vadd.xlane.f32.xlu0 %v787_v12  ;;  %v811_v41 = vsel %vm238_vm0, %v767_v19, 0.0 }
 0x1a9   : > { %682 = vadd.xlane.f32.xlu1 %v681_v49  ;;  %v851_v4 = vadd.s32 8, %v1998_v1  ;;  %v852_v15 = vadd.s32 16, %v1998_v1  ;;  %v853_v50 = vadd.s32 24, %v1998_v1  ;;  %v868_v17 = vadd.s32 %v2004_v2, %v1998_v1 }
 0x1aa   : > { %v854_v47 = vadd.s32 32, %v1998_v1  ;;  %v855_v53 = vadd.s32 40, %v1998_v1  ;;  %v856_v60 = vadd.s32 48, %v1998_v1  ;;  %v857_v63 = vadd.s32 56, %v1998_v1 }
 0x1ab   : > { %v869_v23 = vadd.s32 %v2004_v2, %v851_v4  ;;  %v870_v56 = vadd.s32 %v2004_v2, %v852_v15  ;;  %v871_v38 = vadd.s32 %v2004_v2, %v853_v50  ;;  %vm884_vm4 = vcmp.lt.s32.totalorder %v868_v17, 200 }
 0x1ac   : > { %791 = vadd.xlane.f32.xlu0 %v790_v59  ;;  %v872_v49 = vadd.s32 %v2004_v2, %v854_v47  ;;  %v873_v43 = vadd.s32 %v2004_v2, %v855_v53  ;;  %v858_v19 = vadd.s32 64, %v1998_v1  ;;  %v861_v4 = vadd.s32 88, %v1998_v1 }
 0x1ad   : > { %685 = vadd.xlane.f32.xlu1 %v684_v36  ;;  %vm885_vm0 = vcmp.lt.s32.totalorder %v869_v23, 200  ;;  %vm886_vm5 = vcmp.lt.s32.totalorder %v870_v56, 200  ;;  %vm887_vm6 = vcmp.lt.s32.totalorder %v871_v38, 200 }
 0x1ae   : > { %vm888_vm7 = vcmp.lt.s32.totalorder %v872_v49, 200  ;;  %vm889_vm8 = vcmp.lt.s32.totalorder %v873_v43, 200  ;;  %v879_v47 = vadd.s32 %v2004_v2, %v861_v4 }
 0x1b0   : > { %794 = vadd.xlane.f32.xlu0 %v793_v42  ;;  %vm895_vm14 = vcmp.lt.s32.totalorder %v879_v47, 200 }
 0x1b1   : > { %797 = vadd.xlane.f32.xlu1 %v796_v7 }
 0x1b4   : > { %800 = vadd.xlane.f32.xlu0 %v799_v32  ;;  %v874_v32 = vadd.s32 %v2004_v2, %v856_v60 }
 0x1b5   : > { %803 = vadd.xlane.f32.xlu1 %v802_v39 }
 0x1b6   : > { %vm890_vm9 = vcmp.lt.s32.totalorder %v874_v32, 200 }
 0x1b8   : > { %806 = vadd.xlane.f32.xlu0 %v805_v58 }
 0x1b9   : > { %809 = vadd.xlane.f32.xlu1 %v808_v29  ;;  %v875_v29 = vadd.s32 %v2004_v2, %v857_v63 }
 0x1bb   : > { %vm891_vm10 = vcmp.lt.s32.totalorder %v875_v29, 200 }
 0x1bc   : > { %812 = vadd.xlane.f32.xlu0 %v811_v41 }
 0x1bd   : > { %815 = vadd.xlane.f32.xlu1 %v814_v25 }
 0x202   : > { %v641_v13 = vpop.xlane.xlu1 %640 }
 0x203   : > { %v644_v24 = vpop.xlane.xlu0 %643 }
 0x204   : > { %1211 = vrcp.f32 %v644_v24 }
 0x205   : > { %1213 = vrcp.f32 %v641_v13  ;;  %v859_v13 = vadd.s32 72, %v1998_v1 }
 0x206   : > { %v650_v9 = vpop.xlane.xlu1 %649 }
 0x207   : > { %v647_v55 = vpop.xlane.xlu0 %646 }
 0x208   : > { %1215 = vrcp.f32 %v647_v55 }
 0x209   : > { %1217 = vrcp.f32 %v650_v9 }
 0x20a   : > { %v656_v26 = vpop.xlane.xlu1 %655 }
 0x20b   : > { %v653_v6 = vpop.xlane.xlu0 %652 }
 0x20c   : > { %1219 = vrcp.f32 %v653_v6 }
 0x20d   : > { %1221 = vrcp.f32 %v656_v26 }
 0x20e   : > { %v662_v28 = vpop.xlane.xlu1 %661 }
 0x20f   : > { %v659_v20 = vpop.xlane.xlu0 %658 }
 0x210   : > { %1223 = vrcp.f32 %v659_v20  ;;  %v860_v20 = vadd.s32 80, %v1998_v1 }
 0x211   : > { %v1212_v5 = vpop.eup %1211  ;;  %1225 = vrcp.f32 %v662_v28  ;;  %v876_v28 = vadd.s32 %v2004_v2, %v858_v19 }
 0x212   : > { %v1214_v33 = vpop.eup %1213  ;;  %v878_v50 = vadd.s32 %v2004_v2, %v860_v20 }
 0x213   : > { %vm892_vm11 = vcmp.lt.s32.totalorder %v876_v28, 200 }
 0x214   : > { %vm894_vm13 = vcmp.lt.s32.totalorder %v878_v50, 200 }
 0x215   : > { %v668_v27 = vpop.xlane.xlu1 %667  ;;  %v1216_v62 = vpop.eup %1215 }
 0x216   : > { %v1218_v12 = vpop.eup %1217  ;;  %1227 = vrcp.f32 %v668_v27 }
 0x219   : > { %v665_v61 = vpop.xlane.xlu0 %664  ;;  %v1220_v59 = vpop.eup %1219 }
 0x21a   : > { %1229 = vrcp.f32 %v665_v61  ;;  %v1222_v45 = vpop.eup %1221 }
 0x21d   : > { %v774_v51 = vpop.xlane.xlu0 %773  ;;  %v1224_v3 = vpop.eup %1223 }
 0x21e   : > { %v671_v40 = vpop.xlane.xlu1 %670  ;;  %v820_v48 = vmul.f32 %v1212_v5, %v774_v51  ;;  %v1226_v9 = vpop.eup %1225  ;;  %v877_v51 = vadd.s32 %v2004_v2, %v859_v13 }
 0x21f   : > { %1231 = vrcp.f32 %v671_v40 }
 0x220   : > { %v901_v57 = vsel %vm885_vm0, %v820_v48, 0.0  ;;  %vm893_vm12 = vcmp.lt.s32.totalorder %v877_v51, 200  ;;  %vm937_vm0 = vcmp.eq.s32.totalorder %v1998_v1, 0 }
 0x221   : > { %v777_v16 = vpop.xlane.xlu0 %776 }
 0x222   : > { %v674_v8 = vpop.xlane.xlu1 %673  ;;  %v822_v30 = vmul.f32 %v1216_v62, %v777_v16 }
 0x223   : > { %1233 = vrcp.f32 %v674_v8  ;;  %v1228_v8 = vpop.eup %1227 }
 0x224   : > { %v902_v42 = vsel %vm886_vm5, %v822_v30, 0.0 }
 0x225   : > { %v780_v11 = vpop.xlane.xlu0 %779 }
 0x226   : > { %v677_v35 = vpop.xlane.xlu1 %676  ;;  %v824_v34 = vmul.f32 %v1218_v12, %v780_v11  ;;  %v862_v11 = vadd.s32 96, %v1998_v1 }
 0x227   : > { %1235 = vrcp.f32 %v677_v35  ;;  %v1230_v15 = vpop.eup %1229 }
 0x228   : > { %v903_v39 = vsel %vm887_vm6, %v824_v34, 0.0  ;;  %v880_v30 = vadd.s32 %v2004_v2, %v862_v11 }
 0x229   : > { %v783_v22 = vpop.xlane.xlu0 %782 }
 0x22a   : > { %v771_v44 = vpop.xlane.xlu1 %770  ;;  %v826_v7 = vmul.f32 %v1220_v59, %v783_v22  ;;  %vm896_vm15 = vcmp.lt.s32.totalorder %v880_v30, 200 }
 0x22b   : > { %v818_v31 = vmul.f32 %v1214_v33, %v771_v44  ;;  %v863_v33 = vadd.s32 104, %v1998_v1 }
 0x22c   : > { %v904_v46 = vsel %vm888_vm7, %v826_v7, 0.0  ;;  %v1232_v48 = vpop.eup %1231 }
 0x22d   : > { %v900_v0 = vsel %vm884_vm4, %v818_v31, 0.0  ;;  %v786_v18 = vpop.xlane.xlu0 %785  ;;  %v864_v31 = vadd.s32 112, %v1998_v1  ;;  %v881_v34 = vadd.s32 %v2004_v2, %v863_v33  ;;  %vm938_vm4 = vcmp.eq.s32.totalorder %v1844_v52, 0 }
 0x22e   : > { %v916_v36 = vadd.f32 %v901_v57, %v900_v0  ;;  %v680_v37 = vpop.xlane.xlu1 %679  ;;  %v828_v14 = vmul.f32 %v1222_v45, %v786_v18  ;;  %v865_v0 = vadd.s32 120, %v1998_v1  ;;  %vm939_vm5 = vmand %vm937_vm0, %vm938_vm4 }
 0x22f   : > { %1237 = vrcp.f32 %v680_v37  ;;  %vm897_vm1 = vcmp.lt.s32.totalorder %v881_v34, 200 }
 0x230   : > { %v917_v54 = vadd.f32 %v916_v36, %v902_v42  ;;  %v905_v24 = vsel %vm889_vm8, %v828_v14, 0.0  ;;  %v1234_v38 = vpop.eup %1233  ;;  %v882_v42 = vadd.s32 %v2004_v2, %v864_v31 }
 0x231   : > { %v789_v58 = vpop.xlane.xlu0 %788 }
 0x232   : > { %v918_v10 = vadd.f32 %v917_v54, %v903_v39  ;;  %v683_v21 = vpop.xlane.xlu1 %682  ;;  %v830_v41 = vmul.f32 %v1224_v3, %v789_v58  ;;  %v883_v39 = vadd.s32 %v2004_v2, %v865_v0  ;;  %vm898_vm2 = vcmp.lt.s32.totalorder %v882_v42, 200 }
 0x233   : > { %1239 = vrcp.f32 %v683_v21 }
 0x234   : > { %v919_v25 = vadd.f32 %v918_v10, %v904_v46  ;;  %v906_v27 = vsel %vm890_vm9, %v830_v41, 0.0  ;;  %v1236_v59 = vpop.eup %1235  ;;  %vm899_vm3 = vcmp.lt.s32.totalorder %v883_v39, 200 }
 0x235   : > { %v792_v6 = vpop.xlane.xlu0 %791 }
 0x236   : > { %v920_v55 = vadd.f32 %v919_v25, %v905_v24  ;;  %v686_v26 = vpop.xlane.xlu1 %685  ;;  %v832_v61 = vmul.f32 %v1226_v9, %v792_v6 }
 0x237   : > { %1241 = vrcp.f32 %v686_v26 }
 0x238   : > { %v921_v40 = vadd.f32 %v920_v55, %v906_v27  ;;  %v907_v16 = vsel %vm891_vm10, %v832_v61, 0.0 }
 0x239   : > { %v795_v35 = vpop.xlane.xlu0 %794 }
 0x23a   : > { %v798_v23 = vpop.xlane.xlu1 %797  ;;  %v834_v5 = vmul.f32 %v1230_v15, %v795_v35  ;;  %v922_v56 = vadd.f32 %v921_v40, %v907_v16 }
 0x23b   : > { %v836_v17 = vmul.f32 %v1228_v8, %v798_v23 }
 0x23c   : > { %v908_v62 = vsel %vm892_vm11, %v834_v5, 0.0  ;;  %v1238_v37 = vpop.eup %1237 }
 0x23d   : > { %v923_v44 = vadd.f32 %v922_v56, %v908_v62  ;;  %v801_v53 = vpop.xlane.xlu0 %800  ;;  %v909_v12 = vsel %vm893_vm12, %v836_v17, 0.0 }
 0x23e   : > { %v804_v22 = vpop.xlane.xlu1 %803  ;;  %v838_v60 = vmul.f32 %v1232_v48, %v801_v53 }
 0x23f   : > { %v840_v49 = vmul.f32 %v1234_v38, %v804_v22  ;;  %v924_v57 = vadd.f32 %v923_v44, %v909_v12 }
 0x240   : > { %v910_v36 = vsel %vm894_vm13, %v838_v60, 0.0  ;;  %v1240_v14 = vpop.eup %1239 }
 0x241   : > { %v925_v43 = vadd.f32 %v924_v57, %v910_v36  ;;  %v807_v63 = vpop.xlane.xlu0 %806  ;;  %v911_v7 = vsel %vm895_vm14, %v840_v49, 0.0 }
 0x242   : > { %v810_v18 = vpop.xlane.xlu1 %809  ;;  %v842_v54 = vmul.f32 %v1236_v59, %v807_v63 }
 0x243   : > { %v844_v45 = vmul.f32 %v1238_v37, %v810_v18  ;;  %v926_v32 = vadd.f32 %v925_v43, %v911_v7 }
 0x244   : > { %v912_v3 = vsel %vm896_vm15, %v842_v54, 0.0  ;;  %v1242_v10 = vpop.eup %1241 }
 0x245   : > { %v927_v21 = vadd.f32 %v926_v32, %v912_v3  ;;  %v813_v29 = vpop.xlane.xlu0 %812  ;;  %v913_v19 = vsel %vm897_vm1, %v844_v45, 0.0 }
 0x246   : > { %v816_v58 = vpop.xlane.xlu1 %815  ;;  %v846_v41 = vmul.f32 %v1240_v14, %v813_v29 }
 0x247   : > { %v848_v46 = vmul.f32 %v1242_v10, %v816_v58  ;;  %v928_v25 = vadd.f32 %v927_v21, %v913_v19 }
 0x248   : > { %v914_v13 = vsel %vm898_vm2, %v846_v41, 0.0 }
 0x249   : > { %v929_v24 = vadd.f32 %v928_v25, %v914_v13  ;;  %v915_v9 = vsel %vm899_vm3, %v848_v46, 0.0 }
 0x24b   : > { %v930_v55 = vadd.f32 %v929_v24, %v915_v9 }
 0x24d   : > { %v931_v2 = vrot.slane %v930_v55, 4 }
 0x24f   : > { %v932_v26 = vadd.f32 %v931_v2, %v930_v55 }
 0x251   : > { %v933_v6 = vrot.slane %v932_v26, 2 }
 0x253   : > { %v934_v28 = vadd.f32 %v933_v6, %v932_v26 }
 0x255   : > { %v935_v20 = vrot.slane %v934_v28, 1 }
 0x257   : > { %v936_v27 = vadd.f32 %v935_v20, %v934_v28 }
 0x259   : > { %v940_v61 = vsel %vm939_vm5, %v936_v27, 0.0 }
 0x25a   : > { %941 = vst [vmem:[%s177_s4] sm:$0xff] %v940_v61 }
 0x25b   : > { %1256 = shalt.err (!%p1253_p3)
}
 0x25c   : > { %s1257_s13 = scalar_lea.hbm %s2045_s8, 128  ;;  %s1261_s25 = scalar_lea.hbm %s2082_s2, 256 }
 0x25d   : > { %p1258_p4 = scmp.ne.s32.totalorder %s2045_s8, %s1257_s13  ;;  %p1262_p9 = scmp.lt.s32.totalorder %s2045_s8, %s2082_s2 }
 0x25e   : > { %p1263_p10 = scmp.lt.s32.totalorder %s1261_s25, %s1257_s13 }
 0x25f   : > { %p1259_p7 = pnand %p1258_p4, %p1360_p5 }
 0x260   : > { %p1264_p11 = por %p1263_p10, %p1262_p9 }
 0x261   : > { %p1260_p8 = pneg %p1259_p7 }
 0x263   : > { %p1265_p12 = pnand %p1264_p11, %p1260_p8 }
 0x265   : > { %1268 = shalt.err (!%p1265_p12)
}
 0x266   : > { %1041 = dma.vmem_to_hbm [thread:$0]  (%p1360_p5), %s957_s5, 128, %s2045_s8, %s943_s14  }
 0x267 PF: > { %p1047_p13 = scmp.ge.s32.totalorder %s1303_s12, 2  ;;  %s968_s28 = sand.u32 1, %s1291_s9  }
 0x268   : > { %s969_s29 = scalar_lea.sflag [#allocation3], %s968_s28 }
 0x269   : > { %p1044_p0 = pnand %p1047_p13, %p1364_p6 }
 0x26b   : > { %p1045_p1 = pneg %p1044_p0 }
 0x26d   : > { %1286 = dma.done.wait (%p1045_p1), %s969_s29, 128  }
 0x26e   : > { %1288 = vsyncadd (%p1045_p1), %s969_s29, 4294967168  ;;  %p12_p2 = scmp.ge.s32.totalorder %s1347_s15, 4   ;;  %s2108_s9 = smov %s1295_s10 }
 0x26f   : > { %s2109_s10 = smov %s1299_s11  ;;  %s2110_s11 = smov %s1358_s18 }
 0x270   : > { %s2111_s12 = smov %s1347_s15  ;;  %14 = sbr.rel (!%p12_p2) target bundleno = 3 (0x3), region = 66 }
 0x275   :  { %974 = vsyncpa [#allocation3], 1 }
 0x276   :  { %976 = vsyncpa [#allocation3 + $0x1], 1 }

</bundles_post_ra>
